<compile_context>
chip_gen: v7x
topology: tpu7x:2x2x1
jax: 0.10.0
libtpu: 0.0.40
codegen_flags: <defaults>
</compile_context>

<pallas_src>
import functools

import jax
import jax.numpy as jnp
from jax.experimental import pallas as pl
from jax.experimental.pallas import tpu as pltpu

INPUT_UNITS = 198
HIDDEN_UNITS = 80
OUTPUT_UNITS = 1

H_PAD = 128        # hidden dim padded to one full 128-lane vreg
_MAX_TILE_B = 1024  # sweepable (512-2048); amortizes ~0.35us per grid step


def _tdgammon_kernel(x_ref, w1_ref, b1_ref, w2_ref, b2_ref, o_ref):
    # Layer 1 (MXU, f32 accumulate): z1 = x @ (0.5*W1^T) + 0.5*b1
    z1 = jnp.dot(x_ref[...], w1_ref[...], preferred_element_type=jnp.float32)
    t = jnp.tanh(z1 + b1_ref[...])          # EUP; sigmoid(z) = 0.5*t + 0.5
    # Layer 2 (VPU mul + XLU lane-reduce), 0.5 scalings folded into params:
    #   0.5*(h @ w2 + b2) = t @ (0.25*w2) + (0.5*b2 + 0.25*sum(w2))
    z2 = jnp.sum(t * w2_ref[...], axis=-1, keepdims=True) + b2_ref[0, 0]
    o_ref[...] = 0.5 * jnp.tanh(z2) + 0.5   # final sigmoid, (tile_b, 1) f32


def prepare_params(w1, b1, w2, b2, compute_dtype=jnp.bfloat16):
    """One-time host prep (hoisted out of the per-call path).

    Torch layouts in: w1 (80,198), b1 (80,), w2 (1,80), b2 (1,).
    Returns:
      w1_t: (198, 128) compute_dtype, = 0.5 * W1^T zero-padded on hidden dim
      b1_p: (1, 128) f32, = 0.5 * b1 zero-padded
      w2_p: (1, 128) f32, = 0.25 * w2 zero-padded
      b2_p: (1, 1) f32, = 0.5 * b2 + 0.25 * sum(w2)   (SMEM scalar)
    The zero padding in columns 80..127 must be preserved.
    """
    w1 = jnp.asarray(w1, jnp.float32)
    b1 = jnp.asarray(b1, jnp.float32).reshape(-1)
    w2 = jnp.asarray(w2, jnp.float32).reshape(-1)
    b2 = jnp.asarray(b2, jnp.float32).reshape(())

    w1_t = jnp.zeros((INPUT_UNITS, H_PAD), jnp.float32)
    w1_t = w1_t.at[:, :HIDDEN_UNITS].set(0.5 * w1.T)
    b1_p = jnp.zeros((1, H_PAD), jnp.float32)
    b1_p = b1_p.at[0, :HIDDEN_UNITS].set(0.5 * b1)
    w2_p = jnp.zeros((1, H_PAD), jnp.float32)
    w2_p = w2_p.at[0, :HIDDEN_UNITS].set(0.25 * w2)
    b2_p = (0.5 * b2 + 0.25 * jnp.sum(w2)).reshape(1, 1)
    return w1_t.astype(compute_dtype), b1_p, w2_p, b2_p


def _pick_tile_b(batch):
    b8 = max(8, ((batch + 7) // 8) * 8)   # sublane (8-row) granule
    return b8 if b8 <= _MAX_TILE_B else _MAX_TILE_B


@functools.partial(jax.jit, static_argnames=("tile_b",))
def tdgammon_forward(x, w1_t, b1_p, w2_p, b2_p, *, tile_b=None):
    """x: (B, 198) float (bf16 recommended, produced at the source).

    Params from prepare_params().  Returns (B, 1) float32
    = sigmoid(W2 @ sigmoid(W1 @ x + b1) + b2).
    """
    B, F = x.shape
    assert F == INPUT_UNITS, F
    if tile_b is None:
        tile_b = _pick_tile_b(B)
    grid = (pl.cdiv(B, tile_b),)   # ragged last tile masked by Pallas

    cost = pl.CostEstimate(
        flops=2 * B * INPUT_UNITS * HIDDEN_UNITS + 4 * B * HIDDEN_UNITS,
        transcendentals=B * (HIDDEN_UNITS + 1),
        bytes_accessed=(B * INPUT_UNITS * x.dtype.itemsize
                        + B * OUTPUT_UNITS * 4
                        + INPUT_UNITS * H_PAD * w1_t.dtype.itemsize
                        + 2 * H_PAD * 4 + 4),
    )

    return pl.pallas_call(
        _tdgammon_kernel,
        out_shape=jax.ShapeDtypeStruct((B, OUTPUT_UNITS), jnp.float32),
        grid=grid,
        in_specs=[
            # x: tiled over batch, full (unpadded) 198-feature rows.
            pl.BlockSpec((tile_b, INPUT_UNITS), lambda i: (i, 0)),
            # Parameters: VMEM-resident (constant index_map).
            pl.BlockSpec((INPUT_UNITS, H_PAD), lambda i: (0, 0)),
            pl.BlockSpec((1, H_PAD), lambda i: (0, 0)),
            pl.BlockSpec((1, H_PAD), lambda i: (0, 0)),
            # b2: single scalar in SMEM.
            pl.BlockSpec(memory_space=pltpu.MemorySpace.SMEM),
        ],
        out_specs=pl.BlockSpec((tile_b, OUTPUT_UNITS), lambda i: (i, 0)),
        compiler_params=pltpu.CompilerParams(
            dimension_semantics=("parallel",),
            vmem_limit_bytes=32 * 1024 * 1024,
        ),
        cost_estimate=cost,
    )(x, w1_t, b1_p, w2_p, b2_p)


def tdgammon_reference(x, w1, b1, w2, b2):
    h = jax.nn.sigmoid(
        jnp.dot(x, w1.T, precision=jax.lax.Precision.HIGHEST) + b1)
    return jax.nn.sigmoid(
        jnp.dot(h, w2.T, precision=jax.lax.Precision.HIGHEST) + b2)


if __name__ == "__main__":
    key = jax.random.PRNGKey(0)
    kx, k1, k2, k3, k4 = jax.random.split(key, 5)

    # TODO(synk): the module zero-inits every parameter (forward would be the
    # constant sigmoid(0)=0.5); use small random values so the kernel does
    # real arithmetic that can be checked against the reference.
    w1 = 0.1 * jax.random.normal(k1, (HIDDEN_UNITS, INPUT_UNITS), jnp.float32)
    b1 = 0.1 * jax.random.normal(k2, (HIDDEN_UNITS,), jnp.float32)
    w2 = 0.1 * jax.random.normal(k3, (OUTPUT_UNITS, HIDDEN_UNITS), jnp.float32)
    b2 = 0.1 * jax.random.normal(k4, (OUTPUT_UNITS,), jnp.float32)

    # --- batched throughput path: bf16 x produced at the source (no in-jit
    #     cast / padded copy), 3 grid steps with a ragged last tile
    #     (600 = 2*256 + 88) ---
    B = 600
    x_bf16 = jax.random.uniform(kx, (B, INPUT_UNITS), jnp.float32).astype(jnp.bfloat16)
    params_bf16 = prepare_params(w1, b1, w2, b2, compute_dtype=jnp.bfloat16)
    out = jax.block_until_ready(tdgammon_forward(x_bf16, *params_bf16, tile_b=256))
    ref = tdgammon_reference(x_bf16.astype(jnp.float32), w1, b1, w2, b2)
    assert out.shape == (B, OUTPUT_UNITS)
    max_err = float(jnp.abs(out - ref).max())
    assert max_err < 3e-3, max_err

    # --- per-position path (the module evaluates a couple of candidate boards
    #     per ply): B=2, f32 end-to-end, auto tile (8 rows) for a tight check ---
    x_small = jnp.asarray(x_bf16[:2], jnp.float32)
    params_f32 = prepare_params(w1, b1, w2, b2, compute_dtype=jnp.float32)
    out_s = jax.block_until_ready(tdgammon_forward(x_small, *params_f32))
    ref_s = tdgammon_reference(x_small, w1, b1, w2, b2)
    assert out_s.shape == (2, OUTPUT_UNITS)
    assert jnp.allclose(out_s, ref_s, atol=1e-4, rtol=1e-4), (out_s, ref_s)

    print("KERNEL_OK")
</pallas_src>

<mosaic_0001>
module attributes {stable_mosaic.version = 11 : i64} {
  func.func @_tdgammon_kernel(%arg0: i32, %arg1: memref<256x198xbf16, #tpu.memory_space<vmem>>, %arg2: memref<198x128xbf16, #tpu.memory_space<vmem>>, %arg3: memref<1x128xf32, #tpu.memory_space<vmem>>, %arg4: memref<1x128xf32, #tpu.memory_space<vmem>>, %arg5: memref<1x1xf32, #tpu.memory_space<smem>>, %arg6: memref<256x1xf32, #tpu.memory_space<vmem>>) attributes {dimension_semantics = [#tpu.dimension_semantics<parallel>], iteration_bounds = array<i64: 3>, scalar_prefetch = 0 : i64, scratch_operands = 0 : i64, tpu.core_type = #tpu.core_type<tc>, window_params = [{transform_indices = @transform_0, window_bounds = array<i64: 256, 198>}, {pipeline_mode = #tpu.pipeline_mode<synchronous>, transform_indices = @transform_1, window_bounds = array<i64: 198, 128>}, {pipeline_mode = #tpu.pipeline_mode<synchronous>, transform_indices = @transform_2, window_bounds = array<i64: 1, 128>}, {pipeline_mode = #tpu.pipeline_mode<synchronous>, transform_indices = @transform_3, window_bounds = array<i64: 1, 128>}, {transform_indices = @transform_4, window_bounds = array<i64: 1, 1>}, {transform_indices = @transform_5, window_bounds = array<i64: 256, 1>}]} {
    %c0 = arith.constant 0 : index
    %c0_0 = arith.constant 0 : index
    %0 = vector.load %arg1[%c0, %c0_0] : memref<256x198xbf16, #tpu.memory_space<vmem>>, vector<256x198xbf16>
    %c0_1 = arith.constant 0 : index
    %c0_2 = arith.constant 0 : index
    %1 = vector.load %arg2[%c0_1, %c0_2] : memref<198x128xbf16, #tpu.memory_space<vmem>>, vector<198x128xbf16>
    %cst = arith.constant dense<0.000000e+00> : vector<256x128xf32>
    %2 = tpu.matmul %0, %1, %cst {dimension_numbers = #tpu.dot_dimension_numbers<[1], [0], [0], [1], [0, 0, 1, 1], [], []>} : vector<256x198xbf16>, vector<198x128xbf16>, vector<256x128xf32> -> vector<256x128xf32>
    %c0_3 = arith.constant 0 : index
    %c0_4 = arith.constant 0 : index
    %3 = vector.load %arg3[%c0_3, %c0_4] : memref<1x128xf32, #tpu.memory_space<vmem>>, vector<1x128xf32>
    %4 = vector.broadcast %3 : vector<1x128xf32> to vector<256x128xf32>
    %5 = arith.addf %2, %4 : vector<256x128xf32>
    %6 = math.tanh %5 : vector<256x128xf32>
    %c0_5 = arith.constant 0 : index
    %c0_6 = arith.constant 0 : index
    %7 = vector.load %arg4[%c0_5, %c0_6] : memref<1x128xf32, #tpu.memory_space<vmem>>, vector<1x128xf32>
    %8 = vector.broadcast %7 : vector<1x128xf32> to vector<256x128xf32>
    %9 = arith.mulf %6, %8 : vector<256x128xf32>
    %cst_7 = arith.constant dense<0.000000e+00> : vector<256xf32>
    %10 = vector.multi_reduction <add>, %9, %cst_7 [1] : vector<256x128xf32> to vector<256xf32>
    %11 = vector.shape_cast %10 : vector<256xf32> to vector<256x1xf32>
    %c0_8 = arith.constant 0 : index
    %c0_9 = arith.constant 0 : index
    %12 = memref.load %arg5[%c0_8, %c0_9] : memref<1x1xf32, #tpu.memory_space<smem>>
    %13 = vector.broadcast %12 : f32 to vector<256x1xf32>
    %14 = arith.addf %11, %13 : vector<256x1xf32>
    %15 = math.tanh %14 : vector<256x1xf32>
    %cst_10 = arith.constant 5.000000e-01 : f32
    %16 = vector.broadcast %cst_10 : f32 to vector<256x1xf32>
    %17 = arith.mulf %16, %15 : vector<256x1xf32>
    %cst_11 = arith.constant 5.000000e-01 : f32
    %18 = vector.broadcast %cst_11 : f32 to vector<256x1xf32>
    %19 = arith.addf %17, %18 : vector<256x1xf32>
    %c0_12 = arith.constant 0 : index
    %c0_13 = arith.constant 0 : index
    %20 = vector.load %arg6[%c0_12, %c0_13] : memref<256x1xf32, #tpu.memory_space<vmem>>, vector<256x1xf32>
    tpu.vector_store %arg6[%c0_12, %c0_13], %19 {strides = array<i32>} : memref<256x1xf32, #tpu.memory_space<vmem>>, vector<256x1xf32>,
    return
  }
  func.func @transform_0(%arg0: i32) -> (i32, i32) {
    %c0_i32 = arith.constant 0 : i32
    %c0_i32_0 = arith.constant 0 : i32
    return %arg0, %c0_i32 : i32, i32
  }
  func.func @transform_1(%arg0: i32) -> (i32, i32) {
    %c0_i32 = arith.constant 0 : i32
    %c0_i32_0 = arith.constant 0 : i32
    %c0_i32_1 = arith.constant 0 : i32
    return %c0_i32, %c0_i32_0 : i32, i32
  }
  func.func @transform_2(%arg0: i32) -> (i32, i32) {
    %c0_i32 = arith.constant 0 : i32
    %c0_i32_0 = arith.constant 0 : i32
    %c0_i32_1 = arith.constant 0 : i32
    return %c0_i32, %c0_i32_0 : i32, i32
  }
  func.func @transform_3(%arg0: i32) -> (i32, i32) {
    %c0_i32 = arith.constant 0 : i32
    %c0_i32_0 = arith.constant 0 : i32
    %c0_i32_1 = arith.constant 0 : i32
    return %c0_i32, %c0_i32_0 : i32, i32
  }
  func.func @transform_4(%arg0: i32) -> (i32, i32) {
    %c0_i32 = arith.constant 0 : i32
    %c0_i32_0 = arith.constant 0 : i32
    %c0_i32_1 = arith.constant 0 : i32
    return %c0_i32, %c0_i32_0 : i32, i32
  }
  func.func @transform_5(%arg0: i32) -> (i32, i32) {
    %c0_i32 = arith.constant 0 : i32
    %c0_i32_0 = arith.constant 0 : i32
    return %arg0, %c0_i32 : i32, i32
  }
}

</mosaic_0001>

<bundles_post_ra>
// kernel: tdgammon_forward.1
= control target key start
LH: loop header
LB: loop body
LE: loop exit
PB: predicated region body
PF: predicated region fallthrough
CT: control target
= control target key end

     0   :  { %s2374_s0 = inlined_call_operand.vmem [shape: bf16[600,198], index: 0, kind: input, shape index: {}]   ;;  %s2375_s1 = inlined_call_operand.vmem [shape: bf16[198,128], index: 1, kind: input, shape index: {}]   ;;  %s2376_s2 = inlined_call_operand.vmem [shape: f32[1,128], index: 2, kind: input, shape index: {}]   ;;  %s2377_s3 = inlined_call_operand.vmem [shape: f32[1,128], index: 3, kind: input, shape index: {}]   ;;  %s2378_s4 = inlined_call_operand.<no memory space> [shape: f32[1,1], index: 4, kind: input, shape index: {}]   ;;  %s2379_s5 = inlined_call_operand.vmem [shape: f32[600,1], index: 5, kind: output, shape index: {}]  }
   0x1   :  { %10 = sst [smem:[#allocation2]] %s2378_s4 }
   0x2   :  { %s1908_s20 = smov 0   ;;  %s1910_s21 = smov 0  }
   0x3   :  { %s1912_s22 = smov 0  }
   0x4 LB: > { %s1921_s4 = sadd.s32 4294967295, %s1840_s22   ;;  %s1923_s23 = sadd.s32 1, %s1840_s22   ;;  %s1840_s22 = sphi %s1912_s22, %s2388_s22   ;;  %s1836_s21 = sphi %s1910_s21, %s2387_s21   ;;  %s1832_s20 = sphi %s1908_s20, %s2386_s20  }
   0x5   : > { %s130_s24 = ssub.s32 %s1840_s22, %s1923_s23  ;;  %s133_s25 = sadd.s32 1, %s1836_s21 }
   0x6   : > { %p131_p0 = scmp.eq.s32.totalorder %s130_s24, 0  ;;  %p143_p1 = scmp.ne.s32.totalorder %s1836_s21, %s1832_s20 }
   0x7   : > { %p144_p2 = scmp.eq.s32.totalorder %s1921_s4, 2  ;;  %p1393_p3 = scmp.ge.s32.totalorder %s1840_s22, 1 }
   0x8   : > { %s1931_s26 = scalar_select %p131_p0, %s1836_s21, %s133_s25  }
   0x9   : > { %p1933_p4 = por %p144_p2, %p143_p1  ;;  %p200_p5 = scmp.lt.s32.totalorder %s1840_s22, 4 }
   0xb   : > { %p201_p6 = pnand %p1393_p3, %p200_p5 }
   0xc   : > { %v1597_v0 = vld [vmem:[%s2375_s1] sm:$0xff] (!%p201_p6)   ;;  %v1874_v1 = vmov (!%p201_p6), 0   ;;  %v1598_v2 = vld [vmem:[%s2375_s1 + $0x8] sm:$0xff] (!%p201_p6)   ;;  %s1946_s7 = sshll.u32 (!%p201_p6), %s1921_s4, 5  ;;  %v1599_v3 = vld [vmem:[%s2375_s1 + $0x10] sm:$0xff] (!%p201_p6)   ;;  %vm539_vm0 = vcmask (!%p201_p6), 572416  }
   0xd   : > { %204 = sbr.rel (%p201_p6) target bundleno = 572 (0x23c), region = 40  ;;  %592 = vmatprep.subr.bf16.mxu0 (!%p201_p6), %v1874_v1  ;;  %1482 = vmatprep.subr.bf16.mxu1 (!%p201_p6), %v1874_v1  ;;  %p239_p7 = scmp.lt.s32.totalorder (!%p201_p6), %s1946_s7, 74  ;;  %v1600_v4 = vld [vmem:[%s2375_s1 + $0x18] sm:$0xff] (!%p201_p6)   ;;  %v1601_v6 = vld [vmem:[%s2375_s1 + $0x20] sm:$0xff] (!%p201_p6)   ;;  %v1602_v8 = vld [vmem:[%s2375_s1 + $0x28] sm:$0xff] (!%p201_p6)   ;;  %vm588_vm1 = vcmask (!%p201_p6), 1042432  }
   0xe   : > { %593 = vmatpush1.bf16.msra.mxu0 (!%p201_p6), %v1597_v0  ;;  %1495 = vmatpush1.bf16.msra.mxu1 (!%p201_p6), %v1597_v0  ;;  %v1603_v9 = vld [vmem:[%s2375_s1 + $0x30] sm:$0xff] (!%p201_p6)   ;;  %v1604_v10 = vld [vmem:[%s2375_s1 + $0x38] sm:$0xff] (!%p201_p6)   ;;  %v1605_v11 = vld [vmem:[%s2375_s1 + $0x40] sm:$0xff] (!%p201_p6)   ;;  %s888_s22 = sld [smem:[#allocation2]] (!%p201_p6)  ;;  %s230_s24 = sand.u32 (!%p201_p6), 1, %s1832_s20   ;;  %vm1018_vm2 = vcmask (!%p201_p6), 7168  }
   0xf   : > { %594 = vmatprep.subr.bf16.mxu0 (!%p201_p6), %v1874_v1  ;;  %1483 = vmatprep.subr.bf16.mxu1 (!%p201_p6), %v1874_v1  ;;  %v1606_v12 = vld [vmem:[%s2375_s1 + $0x48] sm:$0xff] (!%p201_p6)   ;;  %v1607_v13 = vld [vmem:[%s2375_s1 + $0x50] sm:$0xff] (!%p201_p6)   ;;  %v1608_v14 = vld [vmem:[%s2375_s1 + $0x58] sm:$0xff] (!%p201_p6)   ;;  %s1394_s25 = sshll.u32 (!%p201_p6), %s230_s24, 8 }
  0x10   : > { %v1609_v15 = vld [vmem:[%s2375_s1 + $0x60] ss:$0 sps:$4 sm:$0x77] (!%p201_p6)   ;;  %s2146_s20 = scalar_lea.vmem (!%p201_p6), [#allocation3], %s1394_s25  }
  0x11   : > { %v590_v16 = vsel (!%p201_p6), %vm588_vm1, %v1609_v15, 0  ;;  %v2063_v47 = vld [vmem:[%s2376_s2] ss:$0 sm:$0xff] (!%p201_p6) }
  0x12   : > { %595 = vmatpush1.bf16.msra.mxu0 (!%p201_p6), %v1598_v2  ;;  %1496 = vmatpush1.bf16.msra.mxu1 (!%p201_p6), %v1598_v2 }
  0x13   : > { %596 = vmatprep.subr.bf16.mxu0 (!%p201_p6), %v1874_v1  ;;  %1484 = vmatprep.subr.bf16.mxu1 (!%p201_p6), %v1874_v1 }
  0x14   : > { %s240_s8 = scalar_select %p239_p7, %s1946_s7, 74 }
  0x15   : > { %s1059_s28 = ssub.s32 (%p1933_p4), 75, %s1946_s7  ;;  %s1479_s29 = sshll.u32 (%p1933_p4), %s1921_s4, 8 }
  0x16   : > { %s1478_s11 = sshll.u32 %s240_s8, 3  ;;  %597 = vmatpush1.bf16.msra.mxu0 %v1599_v3  ;;  %1497 = vmatpush1.bf16.msra.mxu1 %v1599_v3  ;;  %p1060_p8 = scmp.lt.s32.totalorder (%p1933_p4), %s1059_s28, 32 }
  0x17   : > { %s1963_s16 = scalar_lea.vmem %s2374_s0, %s1478_s11  ;;  %598 = vmatprep.subr.bf16.mxu0 %v1874_v1  ;;  %1485 = vmatprep.subr.bf16.mxu1 %v1874_v1  ;;  %s2242_s8 = scalar_lea.vmem (%p1933_p4), %s2379_s5, %s1479_s29  }
  0x18   : > { %v1612_v5 = vld [vmem:[%s1963_s16 + $0x4] ss:$8 sps:$4 sm:$0xff]   ;;  %v1610_v17 = vld [vmem:[%s1963_s16] ss:$8 sps:$4 sm:$0xff]   ;;  %v1616_v19 = vld [vmem:[%s1963_s16 + $0x14] ss:$8 sps:$4 sm:$0xff]  }
  0x19   : > { %v1615_v7 = vld [vmem:[%s1963_s16 + $0x84] ss:$8 sps:$4 sm:$0xff]   ;;  %1444 = vmatprep.mubr.msk.bf16.mxu0 %vm539_vm0, %v1612_v5  ;;  %v1613_v18 = vld [vmem:[%s1963_s16 + $0x80] ss:$8 sps:$4 sm:$0xff]   ;;  %v1619_v20 = vld [vmem:[%s1963_s16 + $0x94] ss:$8 sps:$4 sm:$0xff]  }
  0x1a   : > { %599 = vmatpush1.bf16.msra.mxu0 %v1600_v4  ;;  %1498 = vmatpush1.bf16.msra.mxu1 %v1600_v4  ;;  %v1618_v21 = vld [vmem:[%s1963_s16 + $0x10] ss:$8 sps:$4 sm:$0xff]   ;;  %v1622_v23 = vld [vmem:[%s1963_s16 + $0x24] ss:$8 sps:$4 sm:$0xff]   ;;  %v1624_v25 = vld [vmem:[%s1963_s16 + $0x20] ss:$8 sps:$4 sm:$0xff]  }
  0x1b   : > { %600 = vmatprep.subr.bf16.mxu0 %v1874_v1  ;;  %1486 = vmatprep.subr.bf16.mxu1 %v1874_v1  ;;  %v1621_v22 = vld [vmem:[%s1963_s16 + $0x90] ss:$8 sps:$4 sm:$0xff]   ;;  %v1625_v24 = vld [vmem:[%s1963_s16 + $0xa4] ss:$8 sps:$4 sm:$0xff]   ;;  %v1627_v26 = vld [vmem:[%s1963_s16 + $0xa0] ss:$8 sps:$4 sm:$0xff]  }
  0x1c   : > { %1452 = vmatprep.mubr.msk.bf16.mxu1 %vm539_vm0, %v1615_v7  ;;  %v1628_v27 = vld [vmem:[%s1963_s16 + $0x34] ss:$8 sps:$4 sm:$0xff]   ;;  %v1630_v29 = vld [vmem:[%s1963_s16 + $0x30] ss:$8 sps:$4 sm:$0xff]   ;;  %v1634_v31 = vld [vmem:[%s1963_s16 + $0x44] ss:$8 sps:$4 sm:$0xff]  }
  0x1d   : > { %v1631_v28 = vld [vmem:[%s1963_s16 + $0xb4] ss:$8 sps:$4 sm:$0xff]   ;;  %v1633_v30 = vld [vmem:[%s1963_s16 + $0xb0] ss:$8 sps:$4 sm:$0xff]   ;;  %v1637_v32 = vld [vmem:[%s1963_s16 + $0xc4] ss:$8 sps:$4 sm:$0xff]  }
  0x1e   : > { %601 = vmatpush1.bf16.msra.mxu0 %v1601_v6  ;;  %1499 = vmatpush1.bf16.msra.mxu1 %v1601_v6  ;;  %v1636_v33 = vld [vmem:[%s1963_s16 + $0x40] ss:$8 sps:$4 sm:$0xff]   ;;  %v1640_v35 = vld [vmem:[%s1963_s16 + $0x54] ss:$8 sps:$4 sm:$0xff]   ;;  %v1642_v37 = vld [vmem:[%s1963_s16 + $0x50] ss:$8 sps:$4 sm:$0xff]  }
  0x1f   : > { %602 = vmatprep.subr.bf16.mxu0 %v1874_v1  ;;  %1487 = vmatprep.subr.bf16.mxu1 %v1874_v1  ;;  %v1639_v34 = vld [vmem:[%s1963_s16 + $0xc0] ss:$8 sps:$4 sm:$0xff]   ;;  %v1643_v36 = vld [vmem:[%s1963_s16 + $0xd4] ss:$8 sps:$4 sm:$0xff]   ;;  %v1645_v38 = vld [vmem:[%s1963_s16 + $0xd0] ss:$8 sps:$4 sm:$0xff]  }
  0x20   : > { %v1646_v39 = vld [vmem:[%s1963_s16 + $0x64] ss:$8 sps:$4 sm:$0xff]   ;;  %v1648_v41 = vld [vmem:[%s1963_s16 + $0x60] ss:$8 sps:$4 sm:$0xff]   ;;  %v1652_v43 = vld [vmem:[%s1963_s16 + $0x74] ss:$8 sps:$4 sm:$0xff]  }
  0x21   : > { %v1649_v40 = vld [vmem:[%s1963_s16 + $0xe4] ss:$8 sps:$4 sm:$0xff]   ;;  %v1651_v42 = vld [vmem:[%s1963_s16 + $0xe0] ss:$8 sps:$4 sm:$0xff]   ;;  %v1655_v44 = vld [vmem:[%s1963_s16 + $0xf4] ss:$8 sps:$4 sm:$0xff]  }
  0x22   : > { %603 = vmatpush1.bf16.msra.mxu0 %v1602_v8  ;;  %1500 = vmatpush1.bf16.msra.mxu1 %v1602_v8  ;;  %v1654_v45 = vld [vmem:[%s1963_s16 + $0x70] ss:$8 sps:$4 sm:$0xff]   ;;  %v2075_v7 = vld [vmem:[%s2377_s3] ss:$0 sm:$0xff] }
  0x23   : > { %604 = vmatprep.subr.bf16.mxu0 %v1874_v1  ;;  %1488 = vmatprep.subr.bf16.mxu1 %v1874_v1  ;;  %v1657_v46 = vld [vmem:[%s1963_s16 + $0xf0] ss:$8 sps:$4 sm:$0xff]  }
  0x26   : > { %605 = vmatpush1.bf16.msra.mxu0 %v1603_v9  ;;  %1501 = vmatpush1.bf16.msra.mxu1 %v1603_v9 }
  0x27   : > { %606 = vmatprep.subr.bf16.mxu0 %v1874_v1  ;;  %1489 = vmatprep.subr.bf16.mxu1 %v1874_v1 }
  0x2a   : > { %607 = vmatpush1.bf16.msra.mxu0 %v1604_v10  ;;  %1502 = vmatpush1.bf16.msra.mxu1 %v1604_v10 }
  0x2b   : > { %608 = vmatprep.subr.bf16.mxu0 %v1874_v1  ;;  %1490 = vmatprep.subr.bf16.mxu1 %v1874_v1 }
  0x2e   : > { %609 = vmatpush1.bf16.msra.mxu0 %v1605_v11  ;;  %1503 = vmatpush1.bf16.msra.mxu1 %v1605_v11 }
  0x2f   : > { %610 = vmatprep.subr.bf16.mxu0 %v1874_v1  ;;  %1491 = vmatprep.subr.bf16.mxu1 %v1874_v1 }
  0x32   : > { %611 = vmatpush1.bf16.msra.mxu0 %v1606_v12  ;;  %1504 = vmatpush1.bf16.msra.mxu1 %v1606_v12 }
  0x33   : > { %612 = vmatprep.subr.bf16.mxu0 %v1874_v1  ;;  %1492 = vmatprep.subr.bf16.mxu1 %v1874_v1 }
  0x36   : > { %613 = vmatpush1.bf16.msra.mxu0 %v1607_v13  ;;  %1505 = vmatpush1.bf16.msra.mxu1 %v1607_v13 }
  0x37   : > { %614 = vmatprep.subr.bf16.mxu0 %v1874_v1  ;;  %1493 = vmatprep.subr.bf16.mxu1 %v1874_v1 }
  0x3a   : > { %615 = vmatpush1.bf16.msra.mxu0 %v1608_v14  ;;  %1506 = vmatpush1.bf16.msra.mxu1 %v1608_v14 }
  0x3b   : > { %616 = vmatprep.subr.bf16.mxu0 %v1874_v1  ;;  %1494 = vmatprep.subr.bf16.mxu1 %v1874_v1 }
  0x3e   : > { %617 = vmatpush1.bf16.msra.mxu0 %v590_v16  ;;  %1507 = vmatpush1.bf16.msra.mxu1 %v590_v16 }
  0x41   : > { %625 = vmatmul.mubr.bf16.vlgmr.msra.gmra.mrb[0].mxu0 %v1610_v17  ;;  %689 = vmatmul.mubr.bf16.vlgmr.msra.gmra.mrb[0].mxu1 %v1613_v18 }
  0x42   : > { %1445 = vmatprep.mubr.msk.bf16.mxu0 %vm539_vm0, %v1616_v19  ;;  %1453 = vmatprep.mubr.msk.bf16.mxu1 %vm539_vm0, %v1619_v20 }
  0x49   : > { %633 = vmatmul.mubr.bf16.gmra.mrb[4].mxu0 %v1618_v21  ;;  %697 = vmatmul.mubr.bf16.gmra.mrb[4].mxu1 %v1621_v22 }
  0x4a   : > { %1446 = vmatprep.mubr.msk.bf16.mxu0 %vm539_vm0, %v1622_v23  ;;  %1454 = vmatprep.mubr.msk.bf16.mxu1 %vm539_vm0, %v1625_v24 }
  0x51   : > { %641 = vmatmul.mubr.bf16.gmra.mrb[8].mxu0 %v1624_v25  ;;  %705 = vmatmul.mubr.bf16.gmra.mrb[8].mxu1 %v1627_v26 }
  0x52   : > { %1447 = vmatprep.mubr.msk.bf16.mxu0 %vm539_vm0, %v1628_v27  ;;  %1455 = vmatprep.mubr.msk.bf16.mxu1 %vm539_vm0, %v1631_v28 }
  0x59   : > { %649 = vmatmul.mubr.bf16.gmra.mrb[12].mxu0 %v1630_v29  ;;  %713 = vmatmul.mubr.bf16.gmra.mrb[12].mxu1 %v1633_v30 }
  0x5a   : > { %1448 = vmatprep.mubr.msk.bf16.mxu0 %vm539_vm0, %v1634_v31  ;;  %1456 = vmatprep.mubr.msk.bf16.mxu1 %vm539_vm0, %v1637_v32 }
  0x61   : > { %657 = vmatmul.mubr.bf16.gmra.mrb[16].mxu0 %v1636_v33  ;;  %721 = vmatmul.mubr.bf16.gmra.mrb[16].mxu1 %v1639_v34 }
  0x62   : > { %1449 = vmatprep.mubr.msk.bf16.mxu0 %vm539_vm0, %v1640_v35  ;;  %1457 = vmatprep.mubr.msk.bf16.mxu1 %vm539_vm0, %v1643_v36 }
  0x69   : > { %665 = vmatmul.mubr.bf16.gmra.mrb[20].mxu0 %v1642_v37  ;;  %729 = vmatmul.mubr.bf16.gmra.mrb[20].mxu1 %v1645_v38 }
  0x6a   : > { %1450 = vmatprep.mubr.msk.bf16.mxu0 %vm539_vm0, %v1646_v39  ;;  %1458 = vmatprep.mubr.msk.bf16.mxu1 %vm539_vm0, %v1649_v40 }
  0x71   : > { %673 = vmatmul.mubr.bf16.gmra.mrb[24].mxu0 %v1648_v41  ;;  %737 = vmatmul.mubr.bf16.gmra.mrb[24].mxu1 %v1651_v42 }
  0x72   : > { %1451 = vmatprep.mubr.msk.bf16.mxu0 %vm539_vm0, %v1652_v43  ;;  %1459 = vmatprep.mubr.msk.bf16.mxu1 %vm539_vm0, %v1655_v44 }
  0x79   : > { %681 = vmatmul.mubr.bf16.gmra.mrb[28].mxu0 %v1654_v45  ;;  %745 = vmatmul.mubr.bf16.gmra.mrb[28].mxu1 %v1657_v46 }
 0x114   : > { %v626_v48 = vpop.f32.mrb[0].mxu0  ;;  %v690_v49 = vpop.f32.mrb[0].mxu1 }
 0x115   : > { %v627_v50 = vadd.f32 %v2063_v47, %v626_v48  ;;  %v691_v51 = vadd.f32 %v2063_v47, %v690_v49  ;;  %v628_v52 = vpop.f32.mrb[1].mxu0  ;;  %v692_v53 = vpop.f32.mrb[1].mxu1 }
 0x116   : > { %v629_v54 = vpop.f32.mrb[2].mxu0  ;;  %v693_v55 = vpop.f32.mrb[2].mxu1 }
 0x117   : > { %1658 = vtanh.f32 %v627_v50  ;;  %v694_v56 = vadd.f32 %v2063_v47, %v693_v55  ;;  %v631_v57 = vpop.f32.mrb[3].mxu0  ;;  %v695_v58 = vpop.f32.mrb[3].mxu1  ;;  %v630_v59 = vadd.f32 %v2063_v47, %v629_v54 }
 0x118   : > { %1660 = vtanh.f32 %v691_v51 }
 0x119   : > { %1662 = vtanh.f32 %v694_v56 }
 0x11a   : > { %1664 = vtanh.f32 %v630_v59 }
 0x11c   : > { %v634_v60 = vpop.f32.mrb[4].mxu0  ;;  %v698_v61 = vpop.f32.mrb[4].mxu1 }
 0x11d   : > { %v635_v62 = vadd.f32 %v2063_v47, %v634_v60  ;;  %v636_v63 = vpop.f32.mrb[5].mxu0  ;;  %v699_v0 = vadd.f32 %v2063_v47, %v698_v61  ;;  %v700_v1 = vpop.f32.mrb[5].mxu1 }
 0x11e   : > { %v637_v2 = vpop.f32.mrb[6].mxu0  ;;  %v701_v3 = vpop.f32.mrb[6].mxu1 }
 0x11f   : > { %1666 = vtanh.f32 %v635_v62  ;;  %v638_v4 = vadd.f32 %v2063_v47, %v637_v2  ;;  %v639_v5 = vpop.f32.mrb[7].mxu0  ;;  %v703_v6 = vpop.f32.mrb[7].mxu1  ;;  %v702_v9 = vadd.f32 %v2063_v47, %v701_v3 }
 0x120   : > { %1668 = vtanh.f32 %v699_v0 }
 0x121   : > { %v1659_v8 = vpop.eup %1658  ;;  %1670 = vtanh.f32 %v638_v4 }
 0x122   : > { %v792_v10 = vmul.f32 %v1659_v8, %v2075_v7  ;;  %v1661_v11 = vpop.eup %1660  ;;  %1672 = vtanh.f32 %v702_v9 }
 0x123   : > { %v1663_v12 = vpop.eup %1662  ;;  %v808_v21 = vmul.f32 %v1661_v11, %v2075_v7 }
 0x124   : > { %v642_v13 = vpop.f32.mrb[8].mxu0  ;;  %824 = vadd.xlane.f32.xlu0 %v792_v10  ;;  %v706_v14 = vpop.f32.mrb[8].mxu1  ;;  %v809_v17 = vmul.f32 %v1663_v12, %v2075_v7 }
 0x125   : > { %v643_v15 = vadd.f32 %v2063_v47, %v642_v13  ;;  %v644_v16 = vpop.f32.mrb[9].mxu0  ;;  %v707_v18 = vadd.f32 %v2063_v47, %v706_v14  ;;  %v708_v19 = vpop.f32.mrb[9].mxu1 }
 0x126   : > { %v645_v20 = vpop.f32.mrb[10].mxu0  ;;  %v709_v22 = vpop.f32.mrb[10].mxu1  ;;  %858 = vadd.xlane.f32.xlu1 %v809_v17 }
 0x127   : > { %v1665_v23 = vpop.eup %1664  ;;  %1674 = vtanh.f32 %v643_v15  ;;  %v646_v24 = vadd.f32 %v2063_v47, %v645_v20  ;;  %v647_v25 = vpop.f32.mrb[11].mxu0  ;;  %v710_v28 = vadd.f32 %v2063_v47, %v709_v22 }
 0x128   : > { %v711_v26 = vpop.f32.mrb[11].mxu1  ;;  %1676 = vtanh.f32 %v707_v18  ;;  %856 = vadd.xlane.f32.xlu0 %v808_v21  ;;  %v793_v31 = vmul.f32 %v1665_v23, %v2075_v7 }
 0x129   : > { %v1667_v27 = vpop.eup %1666  ;;  %1678 = vtanh.f32 %v646_v24 }
 0x12a   : > { %v1669_v29 = vpop.eup %1668  ;;  %v794_v30 = vmul.f32 %v1667_v27, %v2075_v7  ;;  %1680 = vtanh.f32 %v710_v28 }
 0x12b   : > { %v1671_v32 = vpop.eup %1670  ;;  %v810_v35 = vmul.f32 %v1669_v29, %v2075_v7 }
 0x12c   : > { %v650_v33 = vpop.f32.mrb[12].mxu0  ;;  %828 = vadd.xlane.f32.xlu1 %v794_v30  ;;  %826 = vadd.xlane.f32.xlu0 %v793_v31  ;;  %v714_v34 = vpop.f32.mrb[12].mxu1  ;;  %v795_v41 = vmul.f32 %v1671_v32, %v2075_v7 }
 0x12d   : > { %v651_v36 = vadd.f32 %v2063_v47, %v650_v33  ;;  %v652_v37 = vpop.f32.mrb[13].mxu0  ;;  %v715_v38 = vadd.f32 %v2063_v47, %v714_v34  ;;  %v716_v39 = vpop.f32.mrb[13].mxu1 }
 0x12e   : > { %v653_v40 = vpop.f32.mrb[14].mxu0  ;;  %v717_v42 = vpop.f32.mrb[14].mxu1 }
 0x12f   : > { %v1673_v43 = vpop.eup %1672  ;;  %1682 = vtanh.f32 %v651_v36  ;;  %v654_v44 = vadd.f32 %v2063_v47, %v653_v40  ;;  %v655_v45 = vpop.f32.mrb[15].mxu0  ;;  %v718_v49 = vadd.f32 %v2063_v47, %v717_v42 }
 0x130   : > { %v719_v46 = vpop.f32.mrb[15].mxu1  ;;  %1684 = vtanh.f32 %v715_v38  ;;  %830 = vadd.xlane.f32.xlu1 %v795_v41  ;;  %860 = vadd.xlane.f32.xlu0 %v810_v35  ;;  %v811_v51 = vmul.f32 %v1673_v43, %v2075_v7 }
 0x131   : > { %v1675_v48 = vpop.eup %1674  ;;  %1686 = vtanh.f32 %v654_v44 }
 0x132   : > { %v1677_v50 = vpop.eup %1676  ;;  %v796_v52 = vmul.f32 %v1675_v48, %v2075_v7  ;;  %1688 = vtanh.f32 %v718_v49 }
 0x133   : > { %v1679_v53 = vpop.eup %1678  ;;  %v812_v56 = vmul.f32 %v1677_v50, %v2075_v7 }
 0x134   : > { %v658_v54 = vpop.f32.mrb[16].mxu0  ;;  %862 = vadd.xlane.f32.xlu1 %v811_v51  ;;  %832 = vadd.xlane.f32.xlu0 %v796_v52  ;;  %v722_v55 = vpop.f32.mrb[16].mxu1  ;;  %v797_v62 = vmul.f32 %v1679_v53, %v2075_v7 }
 0x135   : > { %v659_v57 = vadd.f32 %v2063_v47, %v658_v54  ;;  %v660_v58 = vpop.f32.mrb[17].mxu0  ;;  %v723_v59 = vadd.f32 %v2063_v47, %v722_v55  ;;  %v724_v60 = vpop.f32.mrb[17].mxu1 }
 0x136   : > { %v661_v61 = vpop.f32.mrb[18].mxu0  ;;  %v725_v63 = vpop.f32.mrb[18].mxu1 }
 0x137   : > { %v1681_v0 = vpop.eup %1680  ;;  %1690 = vtanh.f32 %v659_v57  ;;  %v662_v1 = vadd.f32 %v2063_v47, %v661_v61  ;;  %v663_v2 = vpop.f32.mrb[19].mxu0  ;;  %v726_v5 = vadd.f32 %v2063_v47, %v725_v63 }
 0x138   : > { %v727_v3 = vpop.f32.mrb[19].mxu1  ;;  %1692 = vtanh.f32 %v723_v59  ;;  %834 = vadd.xlane.f32.xlu1 %v797_v62  ;;  %864 = vadd.xlane.f32.xlu0 %v812_v56  ;;  %v813_v8 = vmul.f32 %v1681_v0, %v2075_v7 }
 0x139   : > { %v1683_v4 = vpop.eup %1682  ;;  %1694 = vtanh.f32 %v662_v1 }
 0x13a   : > { %v1685_v6 = vpop.eup %1684  ;;  %v798_v9 = vmul.f32 %v1683_v4, %v2075_v7  ;;  %1696 = vtanh.f32 %v726_v5 }
 0x13b   : > { %v1687_v10 = vpop.eup %1686  ;;  %v814_v13 = vmul.f32 %v1685_v6, %v2075_v7 }
 0x13c   : > { %v666_v11 = vpop.f32.mrb[20].mxu0  ;;  %866 = vadd.xlane.f32.xlu1 %v813_v8  ;;  %836 = vadd.xlane.f32.xlu0 %v798_v9  ;;  %v730_v12 = vpop.f32.mrb[20].mxu1  ;;  %v799_v19 = vmul.f32 %v1687_v10, %v2075_v7 }
 0x13d   : > { %v667_v14 = vadd.f32 %v2063_v47, %v666_v11  ;;  %v668_v15 = vpop.f32.mrb[21].mxu0  ;;  %v731_v16 = vadd.f32 %v2063_v47, %v730_v12  ;;  %v732_v17 = vpop.f32.mrb[21].mxu1 }
 0x13e   : > { %v669_v18 = vpop.f32.mrb[22].mxu0  ;;  %v733_v20 = vpop.f32.mrb[22].mxu1 }
 0x13f   : > { %v1689_v21 = vpop.eup %1688  ;;  %1698 = vtanh.f32 %v667_v14  ;;  %v670_v22 = vadd.f32 %v2063_v47, %v669_v18  ;;  %v671_v23 = vpop.f32.mrb[23].mxu0  ;;  %v734_v26 = vadd.f32 %v2063_v47, %v733_v20  ;;  %v2134_v20 = vstv %s888_s22 }
 0x140   : > { %v735_v24 = vpop.f32.mrb[23].mxu1  ;;  %1700 = vtanh.f32 %v731_v16  ;;  %838 = vadd.xlane.f32.xlu1 %v799_v19  ;;  %868 = vadd.xlane.f32.xlu0 %v814_v13  ;;  %v815_v28 = vmul.f32 %v1689_v21, %v2075_v7 }
 0x141   : > { %v1691_v25 = vpop.eup %1690  ;;  %1702 = vtanh.f32 %v670_v22 }
 0x142   : > { %v1693_v27 = vpop.eup %1692  ;;  %v800_v29 = vmul.f32 %v1691_v25, %v2075_v7  ;;  %1704 = vtanh.f32 %v734_v26 }
 0x143   : > { %v1695_v30 = vpop.eup %1694  ;;  %v816_v33 = vmul.f32 %v1693_v27, %v2075_v7 }
 0x144   : > { %v674_v31 = vpop.f32.mrb[24].mxu0  ;;  %870 = vadd.xlane.f32.xlu1 %v815_v28  ;;  %840 = vadd.xlane.f32.xlu0 %v800_v29  ;;  %v738_v32 = vpop.f32.mrb[24].mxu1  ;;  %v801_v39 = vmul.f32 %v1695_v30, %v2075_v7 }
 0x145   : > { %v675_v34 = vadd.f32 %v2063_v47, %v674_v31  ;;  %v676_v35 = vpop.f32.mrb[25].mxu0  ;;  %v739_v36 = vadd.f32 %v2063_v47, %v738_v32  ;;  %v740_v37 = vpop.f32.mrb[25].mxu1 }
 0x146   : > { %v677_v38 = vpop.f32.mrb[26].mxu0  ;;  %v741_v40 = vpop.f32.mrb[26].mxu1 }
 0x147   : > { %v1697_v41 = vpop.eup %1696  ;;  %1706 = vtanh.f32 %v675_v34  ;;  %v678_v42 = vadd.f32 %v2063_v47, %v677_v38  ;;  %v679_v43 = vpop.f32.mrb[27].mxu0  ;;  %v742_v46 = vadd.f32 %v2063_v47, %v741_v40 }
 0x148   : > { %v743_v44 = vpop.f32.mrb[27].mxu1  ;;  %1708 = vtanh.f32 %v739_v36  ;;  %842 = vadd.xlane.f32.xlu1 %v801_v39  ;;  %872 = vadd.xlane.f32.xlu0 %v816_v33  ;;  %v817_v49 = vmul.f32 %v1697_v41, %v2075_v7 }
 0x149   : > { %v1699_v45 = vpop.eup %1698  ;;  %1710 = vtanh.f32 %v678_v42 }
 0x14a   : > { %v1701_v48 = vpop.eup %1700  ;;  %v802_v50 = vmul.f32 %v1699_v45, %v2075_v7  ;;  %1712 = vtanh.f32 %v742_v46 }
 0x14b   : > { %v1703_v51 = vpop.eup %1702  ;;  %v818_v54 = vmul.f32 %v1701_v48, %v2075_v7 }
 0x14c   : > { %v682_v52 = vpop.f32.mrb[28].mxu0  ;;  %874 = vadd.xlane.f32.xlu1 %v817_v49  ;;  %844 = vadd.xlane.f32.xlu0 %v802_v50  ;;  %v746_v53 = vpop.f32.mrb[28].mxu1  ;;  %v803_v60 = vmul.f32 %v1703_v51, %v2075_v7 }
 0x14d   : > { %v683_v55 = vadd.f32 %v2063_v47, %v682_v52  ;;  %v684_v56 = vpop.f32.mrb[29].mxu0  ;;  %v747_v57 = vadd.f32 %v2063_v47, %v746_v53  ;;  %v748_v58 = vpop.f32.mrb[29].mxu1 }
 0x14e   : > { %v685_v59 = vpop.f32.mrb[30].mxu0  ;;  %v749_v61 = vpop.f32.mrb[30].mxu1 }
 0x14f   : > { %v1705_v62 = vpop.eup %1704  ;;  %1714 = vtanh.f32 %v683_v55  ;;  %v686_v63 = vadd.f32 %v2063_v47, %v685_v59  ;;  %v687_v0 = vpop.f32.mrb[31].mxu0  ;;  %v750_v1 = vadd.f32 %v2063_v47, %v749_v61 }
 0x150   : > { %v751_v2 = vpop.f32.mrb[31].mxu1  ;;  %1716 = vtanh.f32 %v747_v57  ;;  %846 = vadd.xlane.f32.xlu1 %v803_v60  ;;  %876 = vadd.xlane.f32.xlu0 %v818_v54  ;;  %v819_v5 = vmul.f32 %v1705_v62, %v2075_v7 }
 0x151   : > { %v1707_v3 = vpop.eup %1706  ;;  %1718 = vtanh.f32 %v686_v63 }
 0x152   : > { %v1709_v4 = vpop.eup %1708  ;;  %1720 = vtanh.f32 %v750_v1  ;;  %v804_v6 = vmul.f32 %v1707_v3, %v2075_v7 }
 0x153   : > { %v1711_v8 = vpop.eup %1710  ;;  %v820_v9 = vmul.f32 %v1709_v4, %v2075_v7 }
 0x154   : > { %878 = vadd.xlane.f32.xlu1 %v819_v5  ;;  %848 = vadd.xlane.f32.xlu0 %v804_v6  ;;  %v805_v10 = vmul.f32 %v1711_v8, %v2075_v7  ;;  %v1713_v47 = vpop.eup %1712 }
 0x155   : > { %v821_v13 = vmul.f32 %v1713_v47, %v2075_v7 }
 0x158   : > { %850 = vadd.xlane.f32.xlu1 %v805_v10  ;;  %880 = vadd.xlane.f32.xlu0 %v820_v9 }
 0x159   : > { %v1715_v11 = vpop.eup %1714 }
 0x15a   : > { %v1717_v12 = vpop.eup %1716  ;;  %v806_v14 = vmul.f32 %v1715_v11, %v2075_v7 }
 0x15b   : > { %v1719_v15 = vpop.eup %1718  ;;  %v822_v17 = vmul.f32 %v1717_v12, %v2075_v7 }
 0x15c   : > { %v1721_v16 = vpop.eup %1720  ;;  %882 = vadd.xlane.f32.xlu1 %v821_v13  ;;  %852 = vadd.xlane.f32.xlu0 %v806_v14  ;;  %v807_v19 = vmul.f32 %v1719_v15, %v2075_v7 }
 0x15d   : > { %v823_v18 = vmul.f32 %v1721_v16, %v2075_v7 }
 0x160   : > { %854 = vadd.xlane.f32.xlu1 %v807_v19  ;;  %884 = vadd.xlane.f32.xlu0 %v822_v17 }
 0x164   : > { %886 = vadd.xlane.f32.xlu1 %v823_v18 }
 0x1b1   : > { %v825_v21 = vpop.xlane.xlu0 %824 }
 0x1b2   : > { %v890_v22 = vadd.f32 %v2134_v20, %v825_v21 }
 0x1b3   : > { %v859_v23 = vpop.xlane.xlu1 %858 }
 0x1b4   : > { %1722 = vtanh.f32 %v890_v22  ;;  %v907_v24 = vadd.f32 %v2134_v20, %v859_v23 }
 0x1b5   : > { %v857_v25 = vpop.xlane.xlu0 %856 }
 0x1b6   : > { %v906_v26 = vadd.f32 %v2134_v20, %v857_v25  ;;  %1724 = vtanh.f32 %v907_v24 }
 0x1b8   : > { %1726 = vtanh.f32 %v906_v26 }
 0x1b9   : > { %v829_v7 = vpop.xlane.xlu1 %828  ;;  %v827_v27 = vpop.xlane.xlu0 %826 }
 0x1ba   : > { %v892_v28 = vadd.f32 %v2134_v20, %v829_v7  ;;  %v891_v29 = vadd.f32 %v2134_v20, %v827_v27 }
 0x1bc   : > { %1728 = vtanh.f32 %v892_v28 }
 0x1bd   : > { %1730 = vtanh.f32 %v891_v29  ;;  %v831_v30 = vpop.xlane.xlu1 %830  ;;  %v861_v31 = vpop.xlane.xlu0 %860 }
 0x1be   : > { %v1723_v32 = vpop.eup %1722  ;;  %v893_v33 = vadd.f32 %v2134_v20, %v831_v30  ;;  %v908_v34 = vadd.f32 %v2134_v20, %v861_v31 }
 0x1bf   : > { %v954_v35 = vmul.f32 0.5, %v1723_v32 }
 0x1c0   : > { %1732 = vtanh.f32 %v893_v33  ;;  %v1725_v36 = vpop.eup %1724 }
 0x1c1   : > { %v986_v37 = vadd.f32 0.5, %v954_v35  ;;  %1734 = vtanh.f32 %v908_v34  ;;  %v863_v38 = vpop.xlane.xlu1 %862  ;;  %v833_v39 = vpop.xlane.xlu0 %832  ;;  %v971_v41 = vmul.f32 0.5, %v1725_v36 }
 0x1c2   : > { %v1727_v40 = vpop.eup %1726  ;;  %v909_v42 = vadd.f32 %v2134_v20, %v863_v38  ;;  %v894_v43 = vadd.f32 %v2134_v20, %v833_v39 }
 0x1c3   : > { %1019 = vst.msk [vmem:[%s2146_s20] sm:$0xff] %vm1018_vm2, %v986_v37  ;;  %v970_v44 = vmul.f32 0.5, %v1727_v40  ;;  %v1003_v45 = vadd.f32 0.5, %v971_v41 }
 0x1c4   : > { %1736 = vtanh.f32 %v909_v42 }
 0x1c5   : > { %v1002_v46 = vadd.f32 0.5, %v970_v44  ;;  %1738 = vtanh.f32 %v894_v43  ;;  %v835_v48 = vpop.xlane.xlu1 %834  ;;  %v865_v49 = vpop.xlane.xlu0 %864  ;;  %1036 = vst.msk [vmem:[%s2146_s20 + $0x88] sm:$0xff] %vm1018_vm2, %v1003_v45 }
 0x1c6   : > { %v1729_v50 = vpop.eup %1728  ;;  %v895_v51 = vadd.f32 %v2134_v20, %v835_v48  ;;  %v910_v52 = vadd.f32 %v2134_v20, %v865_v49 }
 0x1c7   : > { %v1731_v53 = vpop.eup %1730  ;;  %1035 = vst.msk [vmem:[%s2146_s20 + $0x80] sm:$0xff] %vm1018_vm2, %v1002_v46  ;;  %v956_v54 = vmul.f32 0.5, %v1729_v50 }
 0x1c8   : > { %v955_v55 = vmul.f32 0.5, %v1731_v53  ;;  %1740 = vtanh.f32 %v895_v51 }
 0x1c9   : > { %v988_v56 = vadd.f32 0.5, %v956_v54  ;;  %1742 = vtanh.f32 %v910_v52  ;;  %v867_v57 = vpop.xlane.xlu1 %866  ;;  %v837_v58 = vpop.xlane.xlu0 %836 }
 0x1ca   : > { %v1733_v59 = vpop.eup %1732  ;;  %v987_v60 = vadd.f32 0.5, %v955_v55  ;;  %v911_v61 = vadd.f32 %v2134_v20, %v867_v57  ;;  %v896_v62 = vadd.f32 %v2134_v20, %v837_v58 }
 0x1cb   : > { %v1735_v63 = vpop.eup %1734  ;;  %1021 = vst.msk [vmem:[%s2146_s20 + $0x10] sm:$0xff] %vm1018_vm2, %v988_v56  ;;  %v957_v0 = vmul.f32 0.5, %v1733_v59 }
 0x1cc   : > { %1020 = vst.msk [vmem:[%s2146_s20 + $0x8] sm:$0xff] %vm1018_vm2, %v987_v60  ;;  %v972_v1 = vmul.f32 0.5, %v1735_v63  ;;  %1744 = vtanh.f32 %v911_v61 }
 0x1cd   : > { %v989_v2 = vadd.f32 0.5, %v957_v0  ;;  %1746 = vtanh.f32 %v896_v62  ;;  %v839_v3 = vpop.xlane.xlu1 %838  ;;  %v869_v4 = vpop.xlane.xlu0 %868 }
 0x1ce   : > { %v1737_v5 = vpop.eup %1736  ;;  %v1004_v6 = vadd.f32 0.5, %v972_v1  ;;  %v897_v8 = vadd.f32 %v2134_v20, %v839_v3  ;;  %v912_v9 = vadd.f32 %v2134_v20, %v869_v4 }
 0x1cf   : > { %v1739_v10 = vpop.eup %1738  ;;  %1022 = vst.msk [vmem:[%s2146_s20 + $0x18] sm:$0xff] %vm1018_vm2, %v989_v2  ;;  %v973_v47 = vmul.f32 0.5, %v1737_v5 }
 0x1d0   : > { %1037 = vst.msk [vmem:[%s2146_s20 + $0x90] sm:$0xff] %vm1018_vm2, %v1004_v6  ;;  %v958_v11 = vmul.f32 0.5, %v1739_v10  ;;  %1748 = vtanh.f32 %v897_v8 }
 0x1d1   : > { %v1005_v12 = vadd.f32 0.5, %v973_v47  ;;  %1750 = vtanh.f32 %v912_v9  ;;  %v871_v13 = vpop.xlane.xlu1 %870  ;;  %v841_v14 = vpop.xlane.xlu0 %840 }
 0x1d2   : > { %v1741_v15 = vpop.eup %1740  ;;  %v990_v16 = vadd.f32 0.5, %v958_v11  ;;  %v913_v17 = vadd.f32 %v2134_v20, %v871_v13  ;;  %v898_v18 = vadd.f32 %v2134_v20, %v841_v14 }
 0x1d3   : > { %v1743_v19 = vpop.eup %1742  ;;  %1038 = vst.msk [vmem:[%s2146_s20 + $0x98] sm:$0xff] %vm1018_vm2, %v1005_v12  ;;  %v959_v21 = vmul.f32 0.5, %v1741_v15 }
 0x1d4   : > { %1023 = vst.msk [vmem:[%s2146_s20 + $0x20] sm:$0xff] %vm1018_vm2, %v990_v16  ;;  %v974_v22 = vmul.f32 0.5, %v1743_v19  ;;  %1752 = vtanh.f32 %v913_v17 }
 0x1d5   : > { %v991_v23 = vadd.f32 0.5, %v959_v21  ;;  %1754 = vtanh.f32 %v898_v18  ;;  %v843_v24 = vpop.xlane.xlu1 %842  ;;  %v873_v25 = vpop.xlane.xlu0 %872 }
 0x1d6   : > { %v1745_v26 = vpop.eup %1744  ;;  %v1006_v7 = vadd.f32 0.5, %v974_v22  ;;  %v899_v27 = vadd.f32 %v2134_v20, %v843_v24  ;;  %v914_v28 = vadd.f32 %v2134_v20, %v873_v25 }
 0x1d7   : > { %v1747_v29 = vpop.eup %1746  ;;  %1024 = vst.msk [vmem:[%s2146_s20 + $0x28] sm:$0xff] %vm1018_vm2, %v991_v23  ;;  %v975_v30 = vmul.f32 0.5, %v1745_v26 }
 0x1d8   : > { %1039 = vst.msk [vmem:[%s2146_s20 + $0xa0] sm:$0xff] %vm1018_vm2, %v1006_v7  ;;  %v960_v31 = vmul.f32 0.5, %v1747_v29  ;;  %1756 = vtanh.f32 %v899_v27 }
 0x1d9   : > { %v1007_v32 = vadd.f32 0.5, %v975_v30  ;;  %1758 = vtanh.f32 %v914_v28  ;;  %v875_v33 = vpop.xlane.xlu1 %874  ;;  %v845_v34 = vpop.xlane.xlu0 %844 }
 0x1da   : > { %v1749_v35 = vpop.eup %1748  ;;  %v992_v36 = vadd.f32 0.5, %v960_v31  ;;  %v915_v37 = vadd.f32 %v2134_v20, %v875_v33  ;;  %v900_v38 = vadd.f32 %v2134_v20, %v845_v34 }
 0x1db   : > { %v1751_v39 = vpop.eup %1750  ;;  %1040 = vst.msk [vmem:[%s2146_s20 + $0xa8] sm:$0xff] %vm1018_vm2, %v1007_v32  ;;  %v961_v40 = vmul.f32 0.5, %v1749_v35 }
 0x1dc   : > { %1025 = vst.msk [vmem:[%s2146_s20 + $0x30] sm:$0xff] %vm1018_vm2, %v992_v36  ;;  %v976_v41 = vmul.f32 0.5, %v1751_v39  ;;  %1760 = vtanh.f32 %v915_v37 }
 0x1dd   : > { %v993_v42 = vadd.f32 0.5, %v961_v40  ;;  %1762 = vtanh.f32 %v900_v38  ;;  %v847_v43 = vpop.xlane.xlu1 %846  ;;  %v877_v44 = vpop.xlane.xlu0 %876 }
 0x1de   : > { %v1753_v45 = vpop.eup %1752  ;;  %v1008_v46 = vadd.f32 0.5, %v976_v41  ;;  %v901_v48 = vadd.f32 %v2134_v20, %v847_v43  ;;  %v916_v49 = vadd.f32 %v2134_v20, %v877_v44 }
 0x1df   : > { %v1755_v50 = vpop.eup %1754  ;;  %1026 = vst.msk [vmem:[%s2146_s20 + $0x38] sm:$0xff] %vm1018_vm2, %v993_v42  ;;  %v977_v51 = vmul.f32 0.5, %v1753_v45 }
 0x1e0   : > { %1041 = vst.msk [vmem:[%s2146_s20 + $0xb0] sm:$0xff] %vm1018_vm2, %v1008_v46  ;;  %v962_v52 = vmul.f32 0.5, %v1755_v50  ;;  %1764 = vtanh.f32 %v901_v48 }
 0x1e1   : > { %v1009_v53 = vadd.f32 0.5, %v977_v51  ;;  %1766 = vtanh.f32 %v916_v49  ;;  %v879_v54 = vpop.xlane.xlu1 %878  ;;  %v849_v55 = vpop.xlane.xlu0 %848 }
 0x1e2   : > { %v1757_v56 = vpop.eup %1756  ;;  %v994_v57 = vadd.f32 0.5, %v962_v52  ;;  %v917_v58 = vadd.f32 %v2134_v20, %v879_v54  ;;  %v902_v59 = vadd.f32 %v2134_v20, %v849_v55 }
 0x1e3   : > { %v1759_v60 = vpop.eup %1758  ;;  %1042 = vst.msk [vmem:[%s2146_s20 + $0xb8] sm:$0xff] %vm1018_vm2, %v1009_v53  ;;  %v963_v61 = vmul.f32 0.5, %v1757_v56 }
 0x1e4   : > { %1027 = vst.msk [vmem:[%s2146_s20 + $0x40] sm:$0xff] %vm1018_vm2, %v994_v57  ;;  %v978_v62 = vmul.f32 0.5, %v1759_v60  ;;  %1768 = vtanh.f32 %v917_v58 }
 0x1e5   : > { %v995_v63 = vadd.f32 0.5, %v963_v61  ;;  %1770 = vtanh.f32 %v902_v59  ;;  %v851_v0 = vpop.xlane.xlu1 %850  ;;  %v881_v1 = vpop.xlane.xlu0 %880 }
 0x1e6   : > { %v1761_v2 = vpop.eup %1760  ;;  %v1010_v3 = vadd.f32 0.5, %v978_v62  ;;  %v903_v4 = vadd.f32 %v2134_v20, %v851_v0  ;;  %v918_v5 = vadd.f32 %v2134_v20, %v881_v1 }
 0x1e7   : > { %v1763_v6 = vpop.eup %1762  ;;  %1028 = vst.msk [vmem:[%s2146_s20 + $0x48] sm:$0xff] %vm1018_vm2, %v995_v63  ;;  %v979_v8 = vmul.f32 0.5, %v1761_v2 }
 0x1e8   : > { %1043 = vst.msk [vmem:[%s2146_s20 + $0xc0] sm:$0xff] %vm1018_vm2, %v1010_v3  ;;  %v964_v9 = vmul.f32 0.5, %v1763_v6  ;;  %1772 = vtanh.f32 %v903_v4 }
 0x1e9   : > { %v1011_v10 = vadd.f32 0.5, %v979_v8  ;;  %1774 = vtanh.f32 %v918_v5  ;;  %v883_v47 = vpop.xlane.xlu1 %882  ;;  %v853_v11 = vpop.xlane.xlu0 %852 }
 0x1ea   : > { %v1765_v12 = vpop.eup %1764  ;;  %v996_v13 = vadd.f32 0.5, %v964_v9  ;;  %v919_v14 = vadd.f32 %v2134_v20, %v883_v47  ;;  %v904_v15 = vadd.f32 %v2134_v20, %v853_v11 }
 0x1eb   : > { %v1767_v16 = vpop.eup %1766  ;;  %1044 = vst.msk [vmem:[%s2146_s20 + $0xc8] sm:$0xff] %vm1018_vm2, %v1011_v10  ;;  %v965_v17 = vmul.f32 0.5, %v1765_v12 }
 0x1ec   : > { %1029 = vst.msk [vmem:[%s2146_s20 + $0x50] sm:$0xff] %vm1018_vm2, %v996_v13  ;;  %v980_v18 = vmul.f32 0.5, %v1767_v16  ;;  %1776 = vtanh.f32 %v919_v14 }
 0x1ed   : > { %v997_v19 = vadd.f32 0.5, %v965_v17  ;;  %1778 = vtanh.f32 %v904_v15  ;;  %v855_v21 = vpop.xlane.xlu1 %854  ;;  %v885_v22 = vpop.xlane.xlu0 %884 }
 0x1ee   : > { %v1769_v23 = vpop.eup %1768  ;;  %v1012_v24 = vadd.f32 0.5, %v980_v18  ;;  %v905_v25 = vadd.f32 %v2134_v20, %v855_v21  ;;  %v920_v26 = vadd.f32 %v2134_v20, %v885_v22 }
 0x1ef   : > { %v1771_v7 = vpop.eup %1770  ;;  %1030 = vst.msk [vmem:[%s2146_s20 + $0x58] sm:$0xff] %vm1018_vm2, %v997_v19  ;;  %v981_v27 = vmul.f32 0.5, %v1769_v23 }
 0x1f0   : > { %1045 = vst.msk [vmem:[%s2146_s20 + $0xd0] sm:$0xff] %vm1018_vm2, %v1012_v24  ;;  %v966_v28 = vmul.f32 0.5, %v1771_v7  ;;  %1780 = vtanh.f32 %v905_v25 }
 0x1f1   : > { %v1013_v29 = vadd.f32 0.5, %v981_v27  ;;  %1782 = vtanh.f32 %v920_v26  ;;  %v887_v30 = vpop.xlane.xlu1 %886 }
 0x1f2   : > { %v1773_v31 = vpop.eup %1772  ;;  %v998_v32 = vadd.f32 0.5, %v966_v28  ;;  %v921_v33 = vadd.f32 %v2134_v20, %v887_v30 }
 0x1f3   : > { %v1775_v34 = vpop.eup %1774  ;;  %1046 = vst.msk [vmem:[%s2146_s20 + $0xd8] sm:$0xff] %vm1018_vm2, %v1013_v29  ;;  %v967_v35 = vmul.f32 0.5, %v1773_v31 }
 0x1f4   : > { %1031 = vst.msk [vmem:[%s2146_s20 + $0x60] sm:$0xff] %vm1018_vm2, %v998_v32  ;;  %v982_v36 = vmul.f32 0.5, %v1775_v34  ;;  %1784 = vtanh.f32 %v921_v33 }
 0x1f5   : > { %v999_v37 = vadd.f32 0.5, %v967_v35 }
 0x1f6   : > { %v1777_v38 = vpop.eup %1776  ;;  %v1014_v39 = vadd.f32 0.5, %v982_v36 }
 0x1f7   : > { %v1779_v40 = vpop.eup %1778  ;;  %1032 = vst.msk [vmem:[%s2146_s20 + $0x68] sm:$0xff] %vm1018_vm2, %v999_v37  ;;  %v983_v41 = vmul.f32 0.5, %v1777_v38 }
 0x1f8   : > { %1047 = vst.msk [vmem:[%s2146_s20 + $0xe0] sm:$0xff] %vm1018_vm2, %v1014_v39  ;;  %v968_v20 = vmul.f32 0.5, %v1779_v40 }
 0x1f9   : > { %v1015_v42 = vadd.f32 0.5, %v983_v41 }
 0x1fa   : > { %v1781_v43 = vpop.eup %1780  ;;  %v1000_v44 = vadd.f32 0.5, %v968_v20 }
 0x1fb   : > { %v1783_v45 = vpop.eup %1782  ;;  %1048 = vst.msk [vmem:[%s2146_s20 + $0xe8] sm:$0xff] %vm1018_vm2, %v1015_v42  ;;  %v969_v46 = vmul.f32 0.5, %v1781_v43 }
 0x1fc   : > { %1033 = vst.msk [vmem:[%s2146_s20 + $0x70] sm:$0xff] %vm1018_vm2, %v1000_v44  ;;  %v984_v48 = vmul.f32 0.5, %v1783_v45 }
 0x1fd   : > { %v1001_v49 = vadd.f32 0.5, %v969_v46  ;;  %1057 = sbr.rel (!%p1933_p4) target bundleno = 572 (0x23c), region = 44 }
 0x1fe   : > { %v1785_v50 = vpop.eup %1784  ;;  %v1016_v51 = vadd.f32 0.5, %v984_v48 }
 0x1ff   : > { %1034 = vst.msk [vmem:[%s2146_s20 + $0x78] sm:$0xff] %vm1018_vm2, %v1001_v49  ;;  %v985_v52 = vmul.f32 0.5, %v1785_v50 }
 0x200   : > { %1049 = vst.msk [vmem:[%s2146_s20 + $0xf0] sm:$0xff] %vm1018_vm2, %v1016_v51 }
 0x201   : > { %v1017_v53 = vadd.f32 0.5, %v985_v52 }
 0x203   : > { %1050 = vst.msk [vmem:[%s2146_s20 + $0xf8] sm:$0xff] %vm1018_vm2, %v1017_v53 }
 0x204   : > { %s2390_s28 = smov (!%p1060_p8, %s1059_s28), 32 }
 0x205   : > { %s1463_s9 = sshll.u32 %s2390_s28, 7 }
 0x206   : > { %p1466_p9 = scmp.eq.s32.totalorder %s1463_s9, 0 }
 0x207   : > { %s2248_s10 = sshrl.u32 (!%p1466_p9), %s2390_s28, 5 }
 0x208   : > { %1068 = sbr.rel (%p1466_p9) target bundleno = 572 (0x23c), region = 48  ;;  %p1467_p10 = scmp.le.s32.totalorder (!%p1466_p9), %s2248_s10, 0 }
 0x20f   : > { %1346 = sbr.rel (%p1467_p10) target bundleno = 551 (0x227), region = 124  ;;  %s2381_s4 = smov (!%p1467_p10), %s2242_s8 }
 0x210   : > { %s2382_s27 = smov (!%p1467_p10), %s2146_s20  ;;  %s2257_s7 = smov (!%p1467_p10), 0  }
 0x211   : > { %s2259_s11 = smov (!%p1467_p10), 0  }
 0x216 LB: >> { %v1192_v54 = vld [vmem:[%s1848_s27] sm:$0xff]  ;;  %v1194_v55 = vld [vmem:[%s1848_s27 + $0x8] sm:$0xff]  ;;  %v1196_v56 = vld [vmem:[%s1848_s27 + $0x10] sm:$0xff]  ;;  %s1256_s12 = sadd.s32 1, %s1852_s7  ;;  %s1186_s11 = sadd.s32 1, %s1856_s11   ;;  %s1856_s11 = sphi %s2259_s11, %s1186_s11   ;;  %s1852_s7 = sphi %s2257_s7, %s2385_s7   ;;  %s1848_s27 = sphi %s2382_s27, %s2384_s27   ;;  %s1844_s4 = sphi %s2381_s4, %s2383_s4  }
 0x217   : >> { %1193 = vst [vmem:[%s1844_s4] sm:$0xff] %v1192_v54  ;;  %1195 = vst [vmem:[%s1844_s4 + $0x8] sm:$0xff] %v1194_v55  ;;  %v1198_v57 = vld [vmem:[%s1848_s27 + $0x18] sm:$0xff]  ;;  %v1200_v58 = vld [vmem:[%s1848_s27 + $0x20] sm:$0xff]  ;;  %p1257_p11 = scmp.ge.s32.totalorder %s1256_s12, %s2248_s10  ;;  %p1185_p12 = scmp.ge.s32.totalorder %s1186_s11, %s2248_s10 }
 0x218   : >> { %1197 = vst [vmem:[%s1844_s4 + $0x10] sm:$0xff] %v1196_v56  ;;  %v1202_v59 = vld [vmem:[%s1848_s27 + $0x28] sm:$0xff]  ;;  %1199 = vst [vmem:[%s1844_s4 + $0x18] sm:$0xff] %v1198_v57  ;;  %v1204_v60 = vld [vmem:[%s1848_s27 + $0x30] sm:$0xff] }
 0x219   : >> { %1201 = vst [vmem:[%s1844_s4 + $0x20] sm:$0xff] %v1200_v58  ;;  %1203 = vst [vmem:[%s1844_s4 + $0x28] sm:$0xff] %v1202_v59  ;;  %v1206_v61 = vld [vmem:[%s1848_s27 + $0x38] sm:$0xff]  ;;  %v1208_v62 = vld [vmem:[%s1848_s27 + $0x40] sm:$0xff]  ;;  %s2392_s12 = smov (%p1257_p11, %s1256_s12), 0 }
 0x21a   : >> { %1205 = vst [vmem:[%s1844_s4 + $0x30] sm:$0xff] %v1204_v60  ;;  %1207 = vst [vmem:[%s1844_s4 + $0x38] sm:$0xff] %v1206_v61  ;;  %v1210_v63 = vld [vmem:[%s1848_s27 + $0x48] sm:$0xff]  ;;  %v1212_v0 = vld [vmem:[%s1848_s27 + $0x50] sm:$0xff]  ;;  %s1468_s13 = sshll.u32 %s2392_s12, 8  ;;  %s2385_s7 = smov %s2392_s12 }
 0x21b   : >> { %1209 = vst [vmem:[%s1844_s4 + $0x40] sm:$0xff] %v1208_v62  ;;  %v1214_v1 = vld [vmem:[%s1848_s27 + $0x58] sm:$0xff]  ;;  %1211 = vst [vmem:[%s1844_s4 + $0x48] sm:$0xff] %v1210_v63  ;;  %v1216_v2 = vld [vmem:[%s1848_s27 + $0x60] sm:$0xff]  ;;  %s2315_s14 = scalar_lea.vmem %s2146_s20, %s1468_s13 [#allocation3]   ;;  %s1262_s15 = scalar_lea.vmem %s2242_s8, %s1468_s13  }
 0x21c   : >> { %1213 = vst [vmem:[%s1844_s4 + $0x50] sm:$0xff] %v1212_v0  ;;  %1215 = vst [vmem:[%s1844_s4 + $0x58] sm:$0xff] %v1214_v1  ;;  %v1218_v3 = vld [vmem:[%s1848_s27 + $0x68] sm:$0xff]  ;;  %v1220_v4 = vld [vmem:[%s1848_s27 + $0x70] sm:$0xff] }
 0x21d   : >> { %1217 = vst [vmem:[%s1844_s4 + $0x60] sm:$0xff] %v1216_v2  ;;  %1219 = vst [vmem:[%s1844_s4 + $0x68] sm:$0xff] %v1218_v3  ;;  %v1222_v5 = vld [vmem:[%s1848_s27 + $0x78] sm:$0xff]  ;;  %v1224_v6 = vld [vmem:[%s1848_s27 + $0x80] sm:$0xff] }
 0x21e   : >> { %1221 = vst [vmem:[%s1844_s4 + $0x70] sm:$0xff] %v1220_v4  ;;  %v1226_v8 = vld [vmem:[%s1848_s27 + $0x88] sm:$0xff]  ;;  %1223 = vst [vmem:[%s1844_s4 + $0x78] sm:$0xff] %v1222_v5  ;;  %v1228_v9 = vld [vmem:[%s1848_s27 + $0x90] sm:$0xff] }
 0x21f   : >> { %1225 = vst [vmem:[%s1844_s4 + $0x80] sm:$0xff] %v1224_v6  ;;  %1227 = vst [vmem:[%s1844_s4 + $0x88] sm:$0xff] %v1226_v8  ;;  %v1230_v10 = vld [vmem:[%s1848_s27 + $0x98] sm:$0xff]  ;;  %v1232_v47 = vld [vmem:[%s1848_s27 + $0xa0] sm:$0xff] }
 0x220   : >> { %1229 = vst [vmem:[%s1844_s4 + $0x90] sm:$0xff] %v1228_v9  ;;  %1231 = vst [vmem:[%s1844_s4 + $0x98] sm:$0xff] %v1230_v10  ;;  %v1234_v11 = vld [vmem:[%s1848_s27 + $0xa8] sm:$0xff]  ;;  %v1236_v12 = vld [vmem:[%s1848_s27 + $0xb0] sm:$0xff]  ;;  %1188 = sbr.rel (!%p1185_p12) target bundleno = 534 (0x216), region = 130 }
 0x221   : >> { %1233 = vst [vmem:[%s1844_s4 + $0xa0] sm:$0xff] %v1232_v47  ;;  %v1238_v13 = vld [vmem:[%s1848_s27 + $0xb8] sm:$0xff]  ;;  %1235 = vst [vmem:[%s1844_s4 + $0xa8] sm:$0xff] %v1234_v11  ;;  %v1240_v14 = vld [vmem:[%s1848_s27 + $0xc0] sm:$0xff] }
 0x222   : >> { %1237 = vst [vmem:[%s1844_s4 + $0xb0] sm:$0xff] %v1236_v12  ;;  %1239 = vst [vmem:[%s1844_s4 + $0xb8] sm:$0xff] %v1238_v13  ;;  %v1242_v15 = vld [vmem:[%s1848_s27 + $0xc8] sm:$0xff]  ;;  %v1244_v16 = vld [vmem:[%s1848_s27 + $0xd0] sm:$0xff] }
 0x223   : >> { %1241 = vst [vmem:[%s1844_s4 + $0xc0] sm:$0xff] %v1240_v14  ;;  %1243 = vst [vmem:[%s1844_s4 + $0xc8] sm:$0xff] %v1242_v15  ;;  %v1246_v17 = vld [vmem:[%s1848_s27 + $0xd8] sm:$0xff]  ;;  %v1248_v18 = vld [vmem:[%s1848_s27 + $0xe0] sm:$0xff] }
 0x224   : >> { %1245 = vst [vmem:[%s1844_s4 + $0xd0] sm:$0xff] %v1244_v16  ;;  %v1250_v19 = vld [vmem:[%s1848_s27 + $0xe8] sm:$0xff]  ;;  %1247 = vst [vmem:[%s1844_s4 + $0xd8] sm:$0xff] %v1246_v17  ;;  %v1252_v21 = vld [vmem:[%s1848_s27 + $0xf0] sm:$0xff] }
 0x225   : >> { %1249 = vst [vmem:[%s1844_s4 + $0xe0] sm:$0xff] %v1248_v18  ;;  %1251 = vst [vmem:[%s1844_s4 + $0xe8] sm:$0xff] %v1250_v19  ;;  %v1254_v22 = vld [vmem:[%s1848_s27 + $0xf8] sm:$0xff]  ;;  %s2384_s27 = smov %s2315_s14 }
 0x226   : >> { %1253 = vst [vmem:[%s1844_s4 + $0xf0] sm:$0xff] %v1252_v21  ;;  %1255 = vst [vmem:[%s1844_s4 + $0xf8] sm:$0xff] %v1254_v22  ;;  %s2383_s4 = smov %s1262_s15 }
 0x227 PF: > { %s2356_s17 = sand.u32 31, %s2390_s28   ;;  %s1480_s18 = sshll.u32 %s2248_s10, 8 }
 0x228   : > { %s1267_s16 = scalar_lea.vmem %s2146_s20, %s1480_s18 [#allocation3]   ;;  %s1269_s19 = scalar_lea.vmem %s2242_s8, %s1480_s18  }
 0x229   : > { %p1473_p13 = scmp.le.s32.totalorder %s2356_s17, 0 }
 0x22a   : > { %s1858_s22 = smov (!%p1473_p13), %s1269_s19   ;;  %s1862_s24 = smov (!%p1473_p13), %s1267_s16  }
 0x22b   : > { %1360 = sbr.rel (%p1473_p13) target bundleno = 572 (0x23c), region = 135  ;;  %s1866_s25 = smov (!%p1473_p13), 0  }
 0x22c   : > { %s1870_s29 = smov (!%p1473_p13), 0  }
 0x232 LB: >> { %v1279_v23 = vld [vmem:[%s1864_s24] sm:$0xff]  ;;  %s1281_s28 = sadd.s32 1, %s1868_s25  ;;  %s1273_s29 = sadd.s32 1, %s1872_s29   ;;  %s1872_s29 = sphi %s1870_s29, %s1273_s29   ;;  %s1868_s25 = sphi %s1866_s25, %s1867_s25   ;;  %s1864_s24 = sphi %s1862_s24, %s1286_s24   ;;  %s1860_s22 = sphi %s1858_s22, %s1287_s22  }
 0x233   : >> { %1280 = vst [vmem:[%s1860_s22] sm:$0xff] %v1279_v23  ;;  %p1282_p0 = scmp.ge.s32.totalorder %s1281_s28, %s2356_s17  ;;  %p1272_p1 = scmp.ge.s32.totalorder %s1273_s29, %s2356_s17 }
 0x235   : >> { %s2394_s28 = smov (%p1282_p0, %s1281_s28), 0  ;;  %1275 = sbr.rel (!%p1272_p1) target bundleno = 562 (0x232), region = 141 }
 0x236   : >> { %s1474_s20 = sshll.u32 %s2394_s28, 3  ;;  %s1867_s25 = smov %s2394_s28  }
 0x237   : >> { %s1286_s24 = scalar_lea.vmem %s1267_s16, %s1474_s20 [#allocation3]   ;;  %s1287_s22 = scalar_lea.vmem %s1269_s19, %s1474_s20  }
 0x23c PF: > { %p13_p2 = scmp.ge.s32.totalorder %s1923_s23, 5   ;;  %s2386_s20 = smov %s1836_s21 }
 0x23d   : > { %s2387_s21 = smov %s1931_s26  ;;  %s2388_s22 = smov %s1923_s23 }
 0x23e   :  { %15 = sbr.rel (!%p13_p2) target bundleno = 4 (0x4), region = 152 }

</bundles_post_ra>
